<compile_context>
chip_gen: v7x
topology: tpu7x:2x2x1
jax: 0.10.0
libtpu: 0.0.40
codegen_flags: <defaults>
</compile_context>

<pallas_src>
import functools

import jax
import jax.numpy as jnp
from jax import lax
from jax.experimental import pallas as pl
from jax.experimental.pallas import tpu as pltpu


def self_attention_kernel(x_full_ref, x_q_ref, wq_ref, wk_ref, wv_ref, wo_ref,
                          o_ref, k_sc, v_sc, *, n_heads):
    # x_full_ref: (1, N, D)   full sequence for this batch element (resident across qi)
    # x_q_ref:    (1, tq, D)  current query tile
    # wq/wk/wv:   (H, D, Dh)  head-major projection weights (scale folded into wq)
    # wo_ref:     (H, Dh, D)  head-major output-projection weights
    # o_ref:      (1, tq, D)
    # k_sc/v_sc:  (H, N, Dh)  VMEM scratch holding K/V for the whole sequence
    H = n_heads
    qi = pl.program_id(1)

    # Compute K/V projections once per batch element; they stay resident in VMEM
    # scratch across the query-tile ("arbitrary") axis.
    @pl.when(qi == 0)
    def _():
        x = x_full_ref[0].astype(wk_ref.dtype)            # (N, D)
        xb = jnp.broadcast_to(x, (H,) + x.shape)          # (H, N, D)
        k_sc[...] = lax.dot_general(
            xb, wk_ref[...], (((2,), (1,)), ((0,), (0,))),
            preferred_element_type=jnp.float32).astype(k_sc.dtype)
        v_sc[...] = lax.dot_general(
            xb, wv_ref[...], (((2,), (1,)), ((0,), (0,))),
            preferred_element_type=jnp.float32).astype(v_sc.dtype)

    # Q projection for this query tile (softmax scale already folded into wq).
    xq = x_q_ref[0].astype(wq_ref.dtype)                  # (tq, D)
    xqb = jnp.broadcast_to(xq, (H,) + xq.shape)           # (H, tq, D)
    q = lax.dot_general(xqb, wq_ref[...], (((2,), (1,)), ((0,), (0,))),
                        preferred_element_type=jnp.float32)   # (H, tq, Dh)

    k = k_sc[...]                                         # (H, N, Dh)
    v = v_sc[...]                                         # (H, N, Dh)

    # Scores: contract the head dims of q and k directly (no K transpose).
    s = lax.dot_general(q.astype(k.dtype), k, (((2,), (2,)), ((0,), (0,))),
                        preferred_element_type=jnp.float32)   # (H, tq, N)

    # Softmax over keys (max-subtracted); normalization via EUP reciprocal on the
    # reduced denominator + one Newton step (negligible cost, f32 accuracy).
    s = s - jnp.max(s, axis=-1, keepdims=True)
    e = jnp.exp(s)
    denom = jnp.sum(e, axis=-1, keepdims=True)            # (H, tq, 1)
    inv = pl.reciprocal(denom, approx=True)
    inv = inv * (2.0 - denom * inv)
    p = e * inv                                           # (H, tq, N)

    # Attention-weighted values, then per-head output projection accumulated
    # over heads (replaces the head concat + single big projection).
    o = lax.dot_general(p.astype(v.dtype), v, (((2,), (1,)), ((0,), (0,))),
                        preferred_element_type=jnp.float32)   # (H, tq, Dh)
    out_h = lax.dot_general(o.astype(wo_ref.dtype), wo_ref[...],
                            (((2,), (1,)), ((0,), (0,))),
                            preferred_element_type=jnp.float32)   # (H, tq, D)
    o_ref[0] = jnp.sum(out_h, axis=0).astype(o_ref.dtype)     # (tq, D)


def self_attention(x, w_qkv, w_out, *, n_heads, dim_head,
                   q_block=None, compute_dtype=None):
    B, N, D = x.shape
    H, Dh = n_heads, dim_head
    inner = H * Dh
    assert w_qkv.shape == (D, 3 * inner)
    assert w_out.shape == (inner, D)

    cdt = jnp.dtype(compute_dtype) if compute_dtype is not None else x.dtype
    scale = Dh ** (-0.5)

    # --- trace-time weight prep (free relative to the kernel) -----------------
    # Fold the softmax scale into the Q weights; lay out all weights head-major
    # so the kernel never slices the lane dimension.
    wq = (w_qkv[:, 0 * inner:1 * inner] * scale).reshape(D, H, Dh).transpose(1, 0, 2).astype(cdt)
    wk = w_qkv[:, 1 * inner:2 * inner].reshape(D, H, Dh).transpose(1, 0, 2).astype(cdt)
    wv = w_qkv[:, 2 * inner:3 * inner].reshape(D, H, Dh).transpose(1, 0, 2).astype(cdt)
    wo = w_out.reshape(H, Dh, D).astype(cdt)

    # --- query tiling ----------------------------------------------------------
    if q_block is not None:
        tq = int(q_block)
    elif N <= 256:
        tq = N
    else:
        tq = N
        for cand in range(256, 0, -8):
            if N % cand == 0:
                tq = cand
                break
    assert N % tq == 0, "query tile must divide N"
    assert tq == N or tq % 8 == 0, "query tile must be a multiple of 8 (or == N)"
    num_q = N // tq

    kernel = functools.partial(self_attention_kernel, n_heads=H)

    return pl.pallas_call(
        kernel,
        out_shape=jax.ShapeDtypeStruct((B, N, D), x.dtype),
        grid=(B, num_q),
        in_specs=[
            pl.BlockSpec((1, N, D), lambda b, qi: (b, 0, 0)),    # full x (for K/V), resident across qi
            pl.BlockSpec((1, tq, D), lambda b, qi: (b, qi, 0)),  # query tile
            pl.BlockSpec((H, D, Dh), lambda b, qi: (0, 0, 0)),   # wq (scale folded)
            pl.BlockSpec((H, D, Dh), lambda b, qi: (0, 0, 0)),   # wk
            pl.BlockSpec((H, D, Dh), lambda b, qi: (0, 0, 0)),   # wv
            pl.BlockSpec((H, Dh, D), lambda b, qi: (0, 0, 0)),   # wo
        ],
        out_specs=pl.BlockSpec((1, tq, D), lambda b, qi: (b, qi, 0)),
        scratch_shapes=[
            pltpu.VMEM((H, N, Dh), cdt),   # K resident across query tiles
            pltpu.VMEM((H, N, Dh), cdt),   # V resident across query tiles
        ],
        compiler_params=pltpu.CompilerParams(
            dimension_semantics=("parallel", "arbitrary"),
            vmem_limit_bytes=64 * 1024 * 1024,
        ),
    )(x, x, wq, wk, wv, wo)


def self_attention_ref(x, w_qkv, w_out, *, n_heads, dim_head):
    """Pure-JAX reference matching the PyTorch module semantics."""
    B, N, D = x.shape
    inner = n_heads * dim_head
    qkv = x @ w_qkv
    q, k, v = jnp.split(qkv, 3, axis=-1)

    def split_heads(t):  # 'b n (h d) -> b h n d'
        return t.reshape(B, N, n_heads, dim_head).transpose(0, 2, 1, 3)

    q, k, v = map(split_heads, (q, k, v))
    dots = jnp.einsum('bhid,bhjd->bhij', q, k) * (dim_head ** -0.5)
    attn = jax.nn.softmax(dots, axis=-1)
    out = jnp.einsum('bhij,bhjd->bhid', attn, v)
    out = out.transpose(0, 2, 1, 3).reshape(B, N, inner)
    return out @ w_out


if __name__ == "__main__":
    # Small shapes consistent with the module's forward: x is (b, n, dim).
    B, N, DIM = 2, 16, 32
    N_HEADS, DIM_HEAD = 4, 8
    INNER = N_HEADS * DIM_HEAD

    key = jax.random.PRNGKey(0)
    kx, kqkv, kout = jax.random.split(key, 3)

    x = jax.random.normal(kx, (B, N, DIM), dtype=jnp.float32)
    # PyTorch Linear stores (out, in); here weights are (in, out), i.e. x @ W.
    w_qkv = jax.random.normal(kqkv, (DIM, 3 * INNER), dtype=jnp.float32) * (DIM ** -0.5)
    w_out = jax.random.normal(kout, (INNER, DIM), dtype=jnp.float32) * (INNER ** -0.5)

    out = self_attention(x, w_qkv, w_out, n_heads=N_HEADS, dim_head=DIM_HEAD)
    out = jax.block_until_ready(out)

    ref = self_attention_ref(x, w_qkv, w_out, n_heads=N_HEADS, dim_head=DIM_HEAD)
    assert out.shape == (B, N, DIM)
    assert jnp.allclose(out, ref, rtol=5e-4, atol=5e-4), "mismatch vs reference"

    print("KERNEL_OK")
</pallas_src>

<mosaic_0001>
module attributes {stable_mosaic.version = 11 : i64} {
  func.func @self_attention_kernel(%arg0: i32, %arg1: i32, %arg2: memref<1x16x32xf32, #tpu.memory_space<vmem>>, %arg3: memref<1x16x32xf32, #tpu.memory_space<vmem>>, %arg4: memref<4x32x8xf32, #tpu.memory_space<vmem>>, %arg5: memref<4x32x8xf32, #tpu.memory_space<vmem>>, %arg6: memref<4x32x8xf32, #tpu.memory_space<vmem>>, %arg7: memref<4x8x32xf32, #tpu.memory_space<vmem>>, %arg8: memref<1x16x32xf32, #tpu.memory_space<vmem>>, %arg9: memref<4x16x8xf32, #tpu.memory_space<vmem>>, %arg10: memref<4x16x8xf32, #tpu.memory_space<vmem>>) attributes {dimension_semantics = [#tpu.dimension_semantics<parallel>, #tpu.dimension_semantics<arbitrary>], iteration_bounds = array<i64: 2, 1>, scalar_prefetch = 0 : i64, scratch_operands = 2 : i64, tpu.core_type = #tpu.core_type<tc>, window_params = [{transform_indices = @transform_0, window_bounds = array<i64: 1, 16, 32>}, {transform_indices = @transform_1, window_bounds = array<i64: 1, 16, 32>}, {pipeline_mode = #tpu.pipeline_mode<synchronous>, transform_indices = @transform_2, window_bounds = array<i64: 4, 32, 8>}, {pipeline_mode = #tpu.pipeline_mode<synchronous>, transform_indices = @transform_3, window_bounds = array<i64: 4, 32, 8>}, {pipeline_mode = #tpu.pipeline_mode<synchronous>, transform_indices = @transform_4, window_bounds = array<i64: 4, 32, 8>}, {pipeline_mode = #tpu.pipeline_mode<synchronous>, transform_indices = @transform_5, window_bounds = array<i64: 4, 8, 32>}, {transform_indices = @transform_6, window_bounds = array<i64: 1, 16, 32>}]} {
    %c0_i32 = arith.constant 0 : i32
    %0 = arith.cmpi eq, %arg1, %c0_i32 : i32
    %1 = arith.extui %0 : i1 to i32
    %c0_i32_0 = arith.constant 0 : i32
    %2 = arith.cmpi ne, %1, %c0_i32_0 : i32
    scf.if %2 {
      %c0_25 = arith.constant 0 : index
      %c0_26 = arith.constant 0 : index
      %c0_27 = arith.constant 0 : index
      %33 = vector.load %arg2[%c0_25, %c0_26, %c0_27] : memref<1x16x32xf32, #tpu.memory_space<vmem>>, vector<1x16x32xf32>
      %34 = vector.shape_cast %33 : vector<1x16x32xf32> to vector<16x32xf32>
      %35 = vector.shape_cast %34 : vector<16x32xf32> to vector<1x16x32xf32>
      %36 = vector.broadcast %35 : vector<1x16x32xf32> to vector<4x16x32xf32>
      %c0_28 = arith.constant 0 : index
      %c0_29 = arith.constant 0 : index
      %c0_30 = arith.constant 0 : index
      %37 = vector.load %arg5[%c0_28, %c0_29, %c0_30] : memref<4x32x8xf32, #tpu.memory_space<vmem>>, vector<4x32x8xf32>
      %cst_31 = arith.constant dense<0.000000e+00> : vector<4x16x8xf32>
      %38 = tpu.matmul %36, %37, %cst_31 {dimension_numbers = #tpu.dot_dimension_numbers<[2], [1], [1], [2], [0, 0, 0, 1, 1, 2], [0], [0]>} : vector<4x16x32xf32>, vector<4x32x8xf32>, vector<4x16x8xf32> -> vector<4x16x8xf32>
      %c0_32 = arith.constant 0 : index
      %c0_33 = arith.constant 0 : index
      %c0_34 = arith.constant 0 : index
      %39 = vector.load %arg9[%c0_32, %c0_33, %c0_34] : memref<4x16x8xf32, #tpu.memory_space<vmem>>, vector<4x16x8xf32>
      tpu.vector_store %arg9[%c0_32, %c0_33, %c0_34], %38 {strides = array<i32>} : memref<4x16x8xf32, #tpu.memory_space<vmem>>, vector<4x16x8xf32>,
      %c0_35 = arith.constant 0 : index
      %c0_36 = arith.constant 0 : index
      %c0_37 = arith.constant 0 : index
      %40 = vector.load %arg6[%c0_35, %c0_36, %c0_37] : memref<4x32x8xf32, #tpu.memory_space<vmem>>, vector<4x32x8xf32>
      %cst_38 = arith.constant dense<0.000000e+00> : vector<4x16x8xf32>
      %41 = tpu.matmul %36, %40, %cst_38 {dimension_numbers = #tpu.dot_dimension_numbers<[2], [1], [1], [2], [0, 0, 0, 1, 1, 2], [0], [0]>} : vector<4x16x32xf32>, vector<4x32x8xf32>, vector<4x16x8xf32> -> vector<4x16x8xf32>
      %c0_39 = arith.constant 0 : index
      %c0_40 = arith.constant 0 : index
      %c0_41 = arith.constant 0 : index
      %42 = vector.load %arg10[%c0_39, %c0_40, %c0_41] : memref<4x16x8xf32, #tpu.memory_space<vmem>>, vector<4x16x8xf32>
      tpu.vector_store %arg10[%c0_39, %c0_40, %c0_41], %41 {strides = array<i32>} : memref<4x16x8xf32, #tpu.memory_space<vmem>>, vector<4x16x8xf32>,
    } else {
    }
    %c0 = arith.constant 0 : index
    %c0_1 = arith.constant 0 : index
    %c0_2 = arith.constant 0 : index
    %3 = vector.load %arg3[%c0, %c0_1, %c0_2] : memref<1x16x32xf32, #tpu.memory_space<vmem>>, vector<1x16x32xf32>
    %4 = vector.shape_cast %3 : vector<1x16x32xf32> to vector<16x32xf32>
    %5 = vector.shape_cast %4 : vector<16x32xf32> to vector<1x16x32xf32>
    %6 = vector.broadcast %5 : vector<1x16x32xf32> to vector<4x16x32xf32>
    %c0_3 = arith.constant 0 : index
    %c0_4 = arith.constant 0 : index
    %c0_5 = arith.constant 0 : index
    %7 = vector.load %arg4[%c0_3, %c0_4, %c0_5] : memref<4x32x8xf32, #tpu.memory_space<vmem>>, vector<4x32x8xf32>
    %cst = arith.constant dense<0.000000e+00> : vector<4x16x8xf32>
    %8 = tpu.matmul %6, %7, %cst {dimension_numbers = #tpu.dot_dimension_numbers<[2], [1], [1], [2], [0, 0, 0, 1, 1, 2], [0], [0]>} : vector<4x16x32xf32>, vector<4x32x8xf32>, vector<4x16x8xf32> -> vector<4x16x8xf32>
    %c0_6 = arith.constant 0 : index
    %c0_7 = arith.constant 0 : index
    %c0_8 = arith.constant 0 : index
    %9 = vector.load %arg9[%c0_6, %c0_7, %c0_8] : memref<4x16x8xf32, #tpu.memory_space<vmem>>, vector<4x16x8xf32>
    %c0_9 = arith.constant 0 : index
    %c0_10 = arith.constant 0 : index
    %c0_11 = arith.constant 0 : index
    %10 = vector.load %arg10[%c0_9, %c0_10, %c0_11] : memref<4x16x8xf32, #tpu.memory_space<vmem>>, vector<4x16x8xf32>
    %cst_12 = arith.constant dense<0.000000e+00> : vector<4x16x16xf32>
    %11 = tpu.matmul %8, %9, %cst_12 {dimension_numbers = #tpu.dot_dimension_numbers<[2], [2], [1], [1], [0, 0, 0, 1, 1, 1], [0], [0]>} : vector<4x16x8xf32>, vector<4x16x8xf32>, vector<4x16x16xf32> -> vector<4x16x16xf32>
    %cst_13 = arith.constant dense<0xFF800000> : vector<4x16xf32>
    %12 = vector.multi_reduction <maximumf>, %11, %cst_13 [2] : vector<4x16x16xf32> to vector<4x16xf32>
    %13 = vector.shape_cast %12 : vector<4x16xf32> to vector<4x16x1xf32>
    %14 = vector.broadcast %13 : vector<4x16x1xf32> to vector<4x16x16xf32>
    %15 = arith.subf %11, %14 : vector<4x16x16xf32>
    %16 = math.exp %15 : vector<4x16x16xf32>
    %cst_14 = arith.constant dense<0.000000e+00> : vector<4x16xf32>
    %17 = vector.multi_reduction <add>, %16, %cst_14 [2] : vector<4x16x16xf32> to vector<4x16xf32>
    %18 = vector.shape_cast %17 : vector<4x16xf32> to vector<4x16x1xf32>
    %19 = tpu.reciprocal %18 {approx = true} : vector<4x16x1xf32> -> vector<4x16x1xf32>
    %20 = arith.mulf %18, %19 : vector<4x16x1xf32>
    %cst_15 = arith.constant 2.000000e+00 : f32
    %21 = vector.broadcast %cst_15 : f32 to vector<4x16x1xf32>
    %22 = arith.subf %21, %20 : vector<4x16x1xf32>
    %23 = arith.mulf %19, %22 : vector<4x16x1xf32>
    %24 = vector.broadcast %23 : vector<4x16x1xf32> to vector<4x16x16xf32>
    %25 = arith.mulf %16, %24 : vector<4x16x16xf32>
    %cst_16 = arith.constant dense<0.000000e+00> : vector<4x16x8xf32>
    %26 = tpu.matmul %25, %10, %cst_16 {dimension_numbers = #tpu.dot_dimension_numbers<[2], [1], [1], [2], [0, 0, 0, 1, 1, 2], [0], [0]>} : vector<4x16x16xf32>, vector<4x16x8xf32>, vector<4x16x8xf32> -> vector<4x16x8xf32>
    %c0_17 = arith.constant 0 : index
    %c0_18 = arith.constant 0 : index
    %c0_19 = arith.constant 0 : index
    %27 = vector.load %arg7[%c0_17, %c0_18, %c0_19] : memref<4x8x32xf32, #tpu.memory_space<vmem>>, vector<4x8x32xf32>
    %cst_20 = arith.constant dense<0.000000e+00> : vector<4x16x32xf32>
    %28 = tpu.matmul %26, %27, %cst_20 {dimension_numbers = #tpu.dot_dimension_numbers<[2], [1], [1], [2], [0, 0, 0, 1, 1, 2], [0], [0]>} : vector<4x16x8xf32>, vector<4x8x32xf32>, vector<4x16x32xf32> -> vector<4x16x32xf32>
    %cst_21 = arith.constant dense<0.000000e+00> : vector<16x32xf32>
    %29 = vector.multi_reduction <add>, %28, %cst_21 [0] : vector<4x16x32xf32> to vector<16x32xf32>
    %c0_22 = arith.constant 0 : index
    %c0_23 = arith.constant 0 : index
    %c0_24 = arith.constant 0 : index
    %30 = vector.load %arg8[%c0_22, %c0_23, %c0_24] : memref<1x16x32xf32, #tpu.memory_space<vmem>>, vector<1x16x32xf32>
    %31 = vector.shape_cast %30 : vector<1x16x32xf32> to vector<16x32xf32>
    %32 = vector.shape_cast %29 : vector<16x32xf32> to vector<1x16x32xf32>
    tpu.vector_store %arg8[%c0_22, %c0_23, %c0_24], %32 {strides = array<i32>} : memref<1x16x32xf32, #tpu.memory_space<vmem>>, vector<1x16x32xf32>,
    return
  }
  func.func @transform_0(%arg0: i32, %arg1: i32) -> (i32, i32, i32) {
    %c0_i32 = arith.constant 0 : i32
    %c0_i32_0 = arith.constant 0 : i32
    %c0_i32_1 = arith.constant 0 : i32
    return %arg0, %c0_i32, %c0_i32_0 : i32, i32, i32
  }
  func.func @transform_1(%arg0: i32, %arg1: i32) -> (i32, i32, i32) {
    %c0_i32 = arith.constant 0 : i32
    %c0_i32_0 = arith.constant 0 : i32
    return %arg0, %arg1, %c0_i32 : i32, i32, i32
  }
  func.func @transform_2(%arg0: i32, %arg1: i32) -> (i32, i32, i32) {
    %c0_i32 = arith.constant 0 : i32
    %c0_i32_0 = arith.constant 0 : i32
    %c0_i32_1 = arith.constant 0 : i32
    %c0_i32_2 = arith.constant 0 : i32
    return %c0_i32, %c0_i32_0, %c0_i32_1 : i32, i32, i32
  }
  func.func @transform_3(%arg0: i32, %arg1: i32) -> (i32, i32, i32) {
    %c0_i32 = arith.constant 0 : i32
    %c0_i32_0 = arith.constant 0 : i32
    %c0_i32_1 = arith.constant 0 : i32
    %c0_i32_2 = arith.constant 0 : i32
    return %c0_i32, %c0_i32_0, %c0_i32_1 : i32, i32, i32
  }
  func.func @transform_4(%arg0: i32, %arg1: i32) -> (i32, i32, i32) {
    %c0_i32 = arith.constant 0 : i32
    %c0_i32_0 = arith.constant 0 : i32
    %c0_i32_1 = arith.constant 0 : i32
    %c0_i32_2 = arith.constant 0 : i32
    return %c0_i32, %c0_i32_0, %c0_i32_1 : i32, i32, i32
  }
  func.func @transform_5(%arg0: i32, %arg1: i32) -> (i32, i32, i32) {
    %c0_i32 = arith.constant 0 : i32
    %c0_i32_0 = arith.constant 0 : i32
    %c0_i32_1 = arith.constant 0 : i32
    %c0_i32_2 = arith.constant 0 : i32
    return %c0_i32, %c0_i32_0, %c0_i32_1 : i32, i32, i32
  }
  func.func @transform_6(%arg0: i32, %arg1: i32) -> (i32, i32, i32) {
    %c0_i32 = arith.constant 0 : i32
    %c0_i32_0 = arith.constant 0 : i32
    return %arg0, %arg1, %c0_i32 : i32, i32, i32
  }
}

</mosaic_0001>

<bundles_post_ra>
// kernel: tpu_custom_call.1
= control target key start
LH: loop header
LB: loop body
LE: loop exit
PB: predicated region body
PF: predicated region fallthrough
CT: control target
= control target key end

     0   :  { %s4229_s0 = inlined_call_operand.hbm [shape: f32[2,16,32], index: 0, kind: input, shape index: {}]   ;;  %s4230_s1 = inlined_call_operand.hbm [shape: f32[2,16,32], index: 1, kind: input, shape index: {}]   ;;  %s4231_s2 = inlined_call_operand.hbm [shape: f32[4,32,8], index: 2, kind: input, shape index: {}]   ;;  %s4232_s3 = inlined_call_operand.hbm [shape: f32[4,32,8], index: 3, kind: input, shape index: {}]   ;;  %s4233_s4 = inlined_call_operand.hbm [shape: f32[4,32,8], index: 4, kind: input, shape index: {}]   ;;  %s4234_s5 = inlined_call_operand.hbm [shape: f32[4,8,32], index: 5, kind: input, shape index: {}]   ;;  %s4235_s6 = inlined_call_operand.hbm [shape: f32[2,16,32], index: 6, kind: output, shape index: {}]  }
   0x1   :  { %4245 = sst [smem:[#allocation24_spill]] %s4229_s0 }
   0x2   :  { %4246 = sst [smem:[#allocation25_spill]] %s4231_s2 }
   0x3   :  { %4247 = sst [smem:[#allocation26_spill]] %s4232_s3 }
   0x4   :  { %4248 = sst [smem:[#allocation27_spill]] %s4233_s4 }
   0x5   :  { %4249 = sst [smem:[#allocation28_spill]] %s4234_s5 }
   0x6   :  { %11 = vsyncpa [#allocation5], 0 }
   0x7   :  { %13 = vsyncpa [#allocation5 + $0x1], 0 }
   0x8   :  { %14 = vsyncpa [#allocation8], 0 }
   0x9   :  { %16 = vsyncpa [#allocation8 + $0x1], 0 }
   0xa   :  { %17 = vsyncpa [#allocation11], 0 }
   0xb   :  { %18 = vsyncpa [#allocation14], 0 }
   0xc   :  { %19 = vsyncpa [#allocation6], 0 }
   0xd   :  { %21 = vsyncpa [#allocation6 + $0x1], 0  ;;  %s3693_s21 = smov 0   ;;  %s3695_s22 = smov 0  }
   0xe   :  { %s3697_s23 = smov 0   ;;  %s3699_s24 = smov 0  }
   0xf   :  { %s3701_s25 = smov 0   ;;  %s3703_s26 = smov 0  }
  0x10 LB: > { %4250 = sst [smem:[#allocation22_spill]] %s3625_s21  ;;  %s3724_s27 = sadd.s32 4294967295, %s3645_s26   ;;  %s3645_s26 = sphi %s3703_s26, %s27_s26   ;;  %s3641_s25 = sphi %s3701_s25, %s4285_s25   ;;  %s3637_s24 = sphi %s3699_s24, %s4284_s24   ;;  %s3633_s23 = sphi %s3697_s23, %s4283_s23   ;;  %s3629_s22 = sphi %s3695_s22, %s4282_s22   ;;  %s3625_s21 = sphi %s3693_s21, %s4281_s21  }
  0x11   : > { %s2686_s28 = sadd.s32 4294967294, %s3645_s26   ;;  %p59_p0 = scmp.ne.s32.totalorder %s3629_s22, %s3625_s21 }
  0x12   : > { %p4236_p1 = scmp.eq.s32.totalorder %s3724_s27, 0  ;;  %p203_p3 = scmp.eq.s32.totalorder %s2686_s28, 1 }
  0x13   : > { %p2687_p5 = scmp.ge.s32.totalorder %s3645_s26, 1  ;;  %p210_p7 = scmp.lt.s32.totalorder %s3645_s26, 3 }
  0x14   : > { %p3733_p4 = por %p4236_p1, %p59_p0  ;;  %p3738_p6 = por %p203_p3, %p59_p0 }
  0x15   : > { %p3743_p8 = pnand %p2687_p5, %p210_p7  ;;  %s3647_s8 = smov [#allocation9]  }
  0x16   : > { %s4251_s29 = scalar_select %p3733_p4, 1, 0 }
  0x17   : > { %s4252_s30 = scalar_select %p3738_p6, 1, 0 }
  0x18   : > { %s4254_s7 = scalar_select %p3743_p8, 1, 0 }
  0x19   : > { %4253 = sst [smem:[#allocation23_spill]] %s4252_s30  ;;  %s222_s9 = sshll.u32 %s3647_s8, 4  ;;  %s3747_s9 = int_to_ptr.vmem [resolvable:$true] %s222_s9 }
  0x1a   : > { %p3253_p9 = pneg %p3743_p8  ;;  %s3648_s11 = smov [#allocation10]  }
  0x1b   : > { %s235_s12 = sshll.u32 %s3648_s11, 4  ;;  %s3649_s13 = smov [#allocation12]   ;;  %s3758_s12 = int_to_ptr.vmem [resolvable:$true] %s235_s12 }
  0x1c   : > { %p3754_p11 = pnand %p3253_p9, %p4236_p1  ;;  %s3760_s14 = sshll.u32 %s3649_s13, 4  ;;  %s249_s14 = int_to_ptr.vmem [resolvable:$true] %s3760_s14 }
  0x1d   : > { %s4256_s2 = sld [smem:[#allocation25_spill]] }
  0x1e   : > { %p3770_p13 = pneg %p3754_p11 }
  0x23   : > { %s3375_s17 = scalar_lea.hbm %s4256_s2, 2048 }
  0x24   : > { %p3376_p12 = scmp.ne.s32.totalorder %s4256_s2, %s3375_s17  ;;  %p3382_p5 = scmp.lt.u32.totalorder %s3375_s17, %s4256_s2 }
  0x26   : > { %p3378_p0 = pnand %p3770_p13, %p3376_p12 }
  0x28   : > { %p3379_p3 = pneg %p3378_p0 }
  0x2a   : > { %p3384_p7 = pnand %p3382_p5, %p3379_p3 }
  0x2c   : > { %3387 = shalt.err (!%p3384_p7)
}
  0x2d   : > { %s3388_s11 = scalar_lea.vmem %s3747_s9, 2048  ;;  %p3396_p2 = scmp.lt.s32.totalorder %s3747_s9, %s3747_s9 }
  0x2e   : > { %p3389_p9 = scmp.ne.s32.totalorder %s3747_s9, %s3388_s11  ;;  %p3397_p6 = scmp.lt.s32.totalorder %s3388_s11, %s3388_s11 }
  0x30   : > { %p3391_p10 = pnand %p3389_p9, %p3770_p13  ;;  %p3398_p12 = por %p3397_p6, %p3396_p2 }
  0x32   : > { %p3392_p1 = pneg %p3391_p10 }
  0x34   : > { %p3399_p0 = pnand %p3398_p12, %p3392_p1 }
  0x36   : > { %3402 = shalt.err (!%p3399_p0)
}
  0x37   : > { %s4241_s13 = smov 128   ;;  %s4243_s15 = smov 8  }
  0x38   : > { %3256 = dma.hbm_to_vmem [thread:$0]  (!%p3754_p11), %s4256_s2, 2048, %s3747_s9, [#allocation8], %s4241_s13, %s4241_s13, %s4243_s15  }
  0x39   : > { %s4258_s3 = sld [smem:[#allocation26_spill]] }
  0x3f   : > { %s3403_s28 = scalar_lea.hbm %s4258_s3, 2048 }
  0x40   : > { %p3404_p1 = scmp.ne.s32.totalorder %s4258_s3, %s3403_s28  ;;  %p3410_p10 = scmp.lt.u32.totalorder %s3403_s28, %s4258_s3 }
  0x42   : > { %p3406_p2 = pnand %p3404_p1, %p3770_p13 }
  0x44   : > { %p3407_p6 = pneg %p3406_p2 }
  0x46   : > { %p3412_p3 = pnand %p3410_p10, %p3407_p6 }
  0x48   : > { %3415 = shalt.err (!%p3412_p3)
}
  0x49   : > { %s3416_s9 = scalar_lea.vmem %s3758_s12, 2048  ;;  %p3424_p12 = scmp.lt.s32.totalorder %s3758_s12, %s3758_s12 }
  0x4a   : > { %p3417_p5 = scmp.ne.s32.totalorder %s3758_s12, %s3416_s9  ;;  %p3425_p0 = scmp.lt.s32.totalorder %s3416_s9, %s3416_s9 }
  0x4c   : > { %p3419_p7 = pnand %p3417_p5, %p3770_p13  ;;  %p3426_p1 = por %p3425_p0, %p3424_p12 }
  0x4e   : > { %p3420_p9 = pneg %p3419_p7 }
  0x50   : > { %p3427_p2 = pnand %p3426_p1, %p3420_p9 }
  0x52   : > { %3430 = shalt.err (!%p3427_p2)
}
  0x53   : > { %3259 = dma.hbm_to_vmem [thread:$0]  (!%p3754_p11), %s4258_s3, 2048, %s3758_s12, [#allocation11], %s4241_s13, %s4241_s13, %s4243_s15  }
  0x54   : > { %s4259_s4 = sld [smem:[#allocation27_spill]] }
  0x5a   : > { %s3431_s18 = scalar_lea.hbm %s4259_s4, 2048 }
  0x5b   : > { %p3432_p6 = scmp.ne.s32.totalorder %s4259_s4, %s3431_s18  ;;  %p3438_p5 = scmp.lt.u32.totalorder %s3431_s18, %s4259_s4 }
  0x5d   : > { %p3434_p10 = pnand %p3432_p6, %p3770_p13 }
  0x5f   : > { %p3435_p3 = pneg %p3434_p10 }
  0x61   : > { %p3440_p7 = pnand %p3438_p5, %p3435_p3 }
  0x63   : > { %3443 = shalt.err (!%p3440_p7)
}
  0x64   : > { %s3444_s9 = scalar_lea.vmem %s249_s14, 2048  ;;  %p3452_p1 = scmp.lt.s32.totalorder %s249_s14, %s249_s14 }
  0x65   : > { %p3445_p9 = scmp.ne.s32.totalorder %s249_s14, %s3444_s9  ;;  %p3453_p2 = scmp.lt.s32.totalorder %s3444_s9, %s3444_s9 }
  0x67   : > { %p3447_p12 = pnand %p3445_p9, %p3770_p13  ;;  %p3454_p4 = por %p3453_p2, %p3452_p1 }
  0x69   : > { %p3448_p0 = pneg %p3447_p12 }
  0x6b   : > { %p3455_p8 = pnand %p3454_p4, %p3448_p0 }
  0x6d   : > { %3458 = shalt.err (!%p3455_p8)
}
  0x6e   : > { %3262 = dma.hbm_to_vmem [thread:$0]  (!%p3754_p11), %s4259_s4, 2048, %s249_s14, [#allocation11], %s4241_s13, %s4241_s13, %s4243_s15  }
  0x6f   : > { %s3652_s30 = smov [#allocation13]   ;;  %s4260_s5 = sld [smem:[#allocation28_spill]] }
  0x70   : > { %s261_s16 = sshll.u32 %s3652_s30, 4  ;;  %s262_s16 = int_to_ptr.vmem [resolvable:$true] %s261_s16 }
  0x75   : > { %s3459_s19 = scalar_lea.hbm %s4260_s5, 512 }
  0x76   : > { %p3460_p4 = scmp.ne.s32.totalorder %s4260_s5, %s3459_s19  ;;  %p3466_p10 = scmp.lt.u32.totalorder %s3459_s19, %s4260_s5 }
  0x78   : > { %p3462_p8 = pnand %p3460_p4, %p3770_p13 }
  0x7a   : > { %p3463_p6 = pneg %p3462_p8 }
  0x7c   : > { %p3468_p3 = pnand %p3466_p10, %p3463_p6 }
  0x7e   : > { %3471 = shalt.err (!%p3468_p3)
}
  0x7f   : > { %s3472_s14 = scalar_lea.vmem %s262_s16, 512  ;;  %p3480_p12 = scmp.lt.s32.totalorder %s262_s16, %s262_s16 }
  0x80   : > { %p3473_p5 = scmp.ne.s32.totalorder %s262_s16, %s3472_s14  ;;  %p3481_p0 = scmp.lt.s32.totalorder %s3472_s14, %s3472_s14 }
  0x82   : > { %p3475_p7 = pnand %p3473_p5, %p3770_p13  ;;  %p3482_p1 = por %p3481_p0, %p3480_p12 }
  0x84   : > { %p3476_p9 = pneg %p3475_p7 }
  0x86   : > { %p3483_p2 = pnand %p3482_p1, %p3476_p9 }
  0x88   : > { %3486 = shalt.err (!%p3483_p2)
}
  0x89   : > { %3265 = dma.hbm_to_vmem [thread:$0]  (!%p3754_p11), %s4260_s5, 512, %s262_s16, [#allocation14], %s4241_s13, %s4241_s13, %s4243_s15  }
  0x8a   : > { %s39_s20 = sadd.s32 1, %s3641_s25  ;;  %s46_s10 = sadd.s32 1, %s3633_s23 }
  0x8b   : > { %p41_p13 = scmp.ge.s32.totalorder %s39_s20, 2  ;;  %p53_p4 = scmp.ne.s32.totalorder %s3633_s23, %s3629_s22 }
  0x8c   : > { %p54_p8 = scmp.eq.s32.totalorder %s3645_s26, 0  ;;  %p3281_p6 = scmp.lt.s32.totalorder %s3645_s26, 2 }
  0x8d   : > { %s4287_s20 = smov (%p41_p13, %s39_s20), 0  ;;  %p4261_p3 = scmp.eq.s32.totalorder %s3724_s27, 1 }
  0x8e   : > { %p55_p10 = por %p54_p8, %p53_p4  ;;  %s43_s17 = ssub.s32 %s3641_s25, %s4287_s20 }
  0x8f   : > { %p3873_p5 = por %p4261_p3, %p53_p4  ;;  %s275_s18 = sand.u32 1, %s3633_s23  }
  0x90   : > { %p44_p7 = scmp.eq.s32.totalorder %s43_s17, 0  ;;  %s3880_s16 = sshll.u32 %s275_s18, 4 }
  0x91   : > { %s2768_s19 = sshll.u32 %s3641_s25, 8  ;;  %s4263_s0 = sld [smem:[#allocation24_spill]] }
  0x92   : > { %s3884_s28 = scalar_select %p44_p7, %s3633_s23, %s46_s10  }
  0x93   : > { %s279_s14 = scalar_lea.vmem [#allocation4], %s3880_s16  ;;  %p3894_p11 = pnand %p3281_p6, %p55_p10 }
  0x94   : > { %s286_s12 = sshll.u32 %s279_s14, 4  ;;  %s3903_s8 = scalar_lea.hbm %s4230_s1, %s2768_s19  ;;  %s3898_s12 = int_to_ptr.vmem [resolvable:$true] %s286_s12 }
  0x95   : > { %s3905_s11 = scalar_lea.sflag [#allocation5], %s275_s18  ;;  %p3489_p12 = pneg %p3894_p11 }
  0x97   : > { %s3889_s9 = scalar_lea.hbm %s4263_s0, %s2768_s19  ;;  %s3492_s2 = scalar_lea.hbm %s4263_s0, 512 }
  0x98   : > { %s3487_s13 = scalar_lea.hbm %s3889_s9, 256  ;;  %p3493_p2 = scmp.lt.u32.totalorder %s3889_s9, %s4263_s0 }
  0x99   : > { %p3488_p9 = scmp.ne.s32.totalorder %s3889_s9, %s3487_s13  ;;  %p3494_p13 = scmp.lt.u32.totalorder %s3492_s2, %s3487_s13 }
  0x9a   : > { %p3496_p8 = scmp.lt.u32.totalorder %s3487_s13, %s3889_s9 }
  0x9b   : > { %p3490_p0 = pnand %p3489_p12, %p3488_p9  ;;  %p3495_p4 = por %p3494_p13, %p3493_p2 }
  0x9d   : > { %p3491_p1 = pneg %p3490_p0  ;;  %p3497_p6 = por %p3496_p8, %p3495_p4 }
  0x9f   : > { %p3498_p10 = pnand %p3497_p6, %p3491_p1 }
  0xa1   : > { %3501 = shalt.err (!%p3498_p10)
}
  0xa2   : > { %s3502_s18 = scalar_lea.vmem %s3898_s12, 256  ;;  %s3653_s15 = smov [#allocation4]  }
  0xa3   : > { %p3503_p3 = scmp.ne.s32.totalorder %s3898_s12, %s3502_s18  ;;  %s3507_s19 = sshll.u32 %s3653_s15, 4  ;;  %s3508_s19 = int_to_ptr.vmem [resolvable:$false] %s3507_s19 }
  0xa4   : > { %s3509_s3 = scalar_lea.vmem %s3508_s19, 512  ;;  %p3510_p0 = scmp.lt.s32.totalorder %s3898_s12, %s3508_s19 }
  0xa5   : > { %p3505_p7 = pnand %p3503_p3, %p3489_p12  ;;  %p3511_p2 = scmp.lt.s32.totalorder %s3509_s3, %s3502_s18 }
  0xa7   : > { %p3506_p9 = pneg %p3505_p7  ;;  %p3512_p13 = por %p3511_p2, %p3510_p0 }
  0xa9   : > { %p3513_p4 = pnand %p3512_p13, %p3506_p9 }
  0xab   : > { %3516 = shalt.err (!%p3513_p4)
}
  0xac   : > { %s4265_s2 = smov 8   ;;  %s4266_s4 = smov 128  }
  0xad   : > { %3269 = dma.hbm_to_vmem [thread:$0]  (!%p3894_p11), %s3889_s9, 256, %s3898_s12, %s3905_s11, %s4266_s4, %s4266_s4, %s4265_s2  }
  0xae   : > { %s300_s13 = scalar_lea.vmem [#allocation7], %s3880_s16  ;;  %s296_s17 = sand.u32 1, %s3645_s26  }
  0xaf   : > { %s309_s10 = sshll.u32 %s300_s13, 4  ;;  %s3940_s14 = scalar_lea.sflag [#allocation8], %s296_s17  ;;  %s3938_s10 = int_to_ptr.vmem [resolvable:$true] %s309_s10 }
  0xb0   : > { %s3517_s18 = scalar_lea.hbm %s3903_s8, 256  ;;  %s3522_s3 = scalar_lea.hbm %s4230_s1, 512 }
  0xb1   : > { %p3518_p1 = scmp.ne.s32.totalorder %s3903_s8, %s3517_s18  ;;  %p3523_p10 = scmp.lt.u32.totalorder %s3903_s8, %s4230_s1 }
  0xb2   : > { %p3524_p3 = scmp.lt.u32.totalorder %s3522_s3, %s3517_s18  ;;  %p3526_p9 = scmp.lt.u32.totalorder %s3517_s18, %s3903_s8 }
  0xb3   : > { %p3520_p8 = pnand %p3518_p1, %p3489_p12 }
  0xb4   : > { %p3525_p7 = por %p3524_p3, %p3523_p10 }
  0xb5   : > { %p3521_p6 = pneg %p3520_p8 }
  0xb6   : > { %p3527_p0 = por %p3526_p9, %p3525_p7 }
  0xb8   : > { %p3528_p2 = pnand %p3527_p0, %p3521_p6 }
  0xba   : > { %3531 = shalt.err (!%p3528_p2)
}
  0xbb   : > { %s3532_s16 = scalar_lea.vmem %s3938_s10, 256  ;;  %s3654_s9 = smov [#allocation7]  }
  0xbc   : > { %p3533_p13 = scmp.ne.s32.totalorder %s3938_s10, %s3532_s16  ;;  %s3537_s12 = sshll.u32 %s3654_s9, 4  ;;  %s3538_s12 = int_to_ptr.vmem [resolvable:$false] %s3537_s12 }
  0xbd   : > { %s3539_s0 = scalar_lea.vmem %s3538_s12, 512  ;;  %p3540_p8 = scmp.lt.s32.totalorder %s3938_s10, %s3538_s12 }
  0xbe   : > { %p3535_p4 = pnand %p3533_p13, %p3489_p12  ;;  %p3541_p10 = scmp.lt.s32.totalorder %s3539_s0, %s3532_s16 }
  0xc0   : > { %p3536_p1 = pneg %p3535_p4  ;;  %p3542_p3 = por %p3541_p10, %p3540_p8 }
  0xc2   : > { %p3543_p7 = pnand %p3542_p3, %p3536_p1 }
  0xc4   : > { %3546 = shalt.err (!%p3543_p7)
}
  0xc5   : > { %3272 = dma.hbm_to_vmem [thread:$0]  (!%p3894_p11), %s3903_s8, 256, %s3938_s10, %s3940_s14, %s4266_s4, %s4266_s4, %s4265_s2  }
  0xc6   : > { %p4267_p12 = scmp.ne.s32.totalorder %s4254_s7, 0 }
  0xc7   : > { %s3972_s5 = sand.u32 (!%p4267_p12), 1, %s3629_s22   ;;  %p4268_p6 = scmp.ne.s32.totalorder (!%p4267_p12), %s4251_s29, 0 }
  0xc8   : > { %321 = sbr.rel (%p4267_p12) target bundleno = 1473 (0x5c1), region = 44  ;;  %s3975_s11 = sshll.u32 (!%p4267_p12), %s3972_s5, 4 }
  0xc9   : > { %s324_s21 = scalar_lea.sflag (!%p4267_p12), [#allocation5], %s3972_s5  ;;  %s327_s13 = scalar_lea.vmem (!%p4267_p12), [#allocation4], %s3975_s11 }
  0xcf   : > { %3600 = dma.done.wait (%p4268_p6), %s324_s21, 256  }
  0xd0   : > { %3602 = vsyncadd (%p4268_p6), %s324_s21, 4294967040  ;;  %s332_s7 = sand.u32 1, %s3724_s27   ;;  %s336_s2 = scalar_lea.vmem [#allocation7], %s3975_s11 }
  0xd1   : > { %s333_s8 = scalar_lea.sflag [#allocation8], %s332_s7 }
  0xd2   : > { %3604 = dma.done.wait (%p4268_p6), %s333_s8, 256  }
  0xd3   : > { %3606 = vsyncadd (%p4268_p6), %s333_s8, 4294967040  ;;  %p4269_p11 = scmp.eq.s32.totalorder %s3724_s27, 0 }
  0xd5   : > { %3608 = dma.done.wait (%p4269_p11), [#allocation8], 2048   ;;  %p4270_p9 = pmov %p4269_p11 }
  0xd7   : > { %3610 = vsyncadd (%p4270_p9), [#allocation8], 4294965248  ;;  %p4271_p0 = pmov %p4270_p9 }
  0xd9   : > { %3612 = dma.done.wait (%p4271_p0), [#allocation11], 4096   ;;  %p4272_p2 = pmov %p4271_p0 }
  0xda   : > { %p4273_p13 = pmov %p4271_p0 }
  0xdb   : > { %3614 = vsyncadd (%p4272_p2), [#allocation11], 4294963200 }
  0xdc   : > { %3616 = dma.done.wait (%p4273_p13), [#allocation14], 512   ;;  %p4274_p4 = pmov %p4271_p0 }
  0xdd   : > { %v394_v0 = vld [vmem:[#allocation10] sm:$0xff]  ;;  %v395_v1 = vld [vmem:[#allocation10 + $0x8] sm:$0xff]  ;;  %vm410_vm0 = vcmask 261120   ;;  %v396_v5 = vld [vmem:[#allocation10 + $0x10] sm:$0xff]  ;;  %vm717_vm1 = vcmask 64512   ;;  %vm1740_vm3 = vcmask 130048  }
  0xde   : > { %3618 = vsyncadd (%p4274_p4), [#allocation14], 4294966784  ;;  %v398_v2 = vld [vmem:[#allocation10 + $0x20] sm:$0xff]  ;;  %v3095_v3 = vpack.c.bf16 %v395_v1, %v394_v0  ;;  %v399_v4 = vld [vmem:[#allocation10 + $0x28] sm:$0xff]  ;;  %s2770_s27 = sshll.u32 %s3637_s24, 8  ;;  %s385_s29 = scalar_lea.vmem [#allocation15], %s3975_s11 }
  0xdf   : > { %v397_v6 = vld [vmem:[#allocation10 + $0x18] sm:$0xff]  ;;  %v3103_v7 = vpack.c.bf16 %v399_v4, %v398_v2  ;;  %v400_v9 = vld [vmem:[#allocation10 + $0x30] sm:$0xff]  ;;  %v402_v13 = vld [vmem:[#allocation10 + $0x40] sm:$0xff]  ;;  %s2537_s4 = sshll.u32 %s385_s29, 4  ;;  %s4176_s14 = scalar_lea.hbm %s4235_s6, %s2770_s27  ;;  %s4178_s4 = int_to_ptr.vmem [resolvable:$true] %s2537_s4 }
  0xe0   : > { %v3099_v8 = vpack.c.bf16 %v397_v6, %v396_v5  ;;  %v401_v10 = vld [vmem:[#allocation10 + $0x38] sm:$0xff]  ;;  %v4003_v11 = vld [vmem:[%s327_s13] sm:$0xff]  ;;  %3096 = vmatprep.subr.bf16.mxu0 %v3095_v3  ;;  %v403_v14 = vld [vmem:[#allocation10 + $0x48] sm:$0xff]  ;;  %s2522_s24 = scalar_lea.sflag [#allocation6], %s3972_s5  ;;  %s3547_s18 = scalar_lea.vmem %s4178_s4, 256 }
  0xe1   : > { %v3107_v12 = vpack.c.bf16 %v401_v10, %v400_v9  ;;  %2895 = vmatprep.mubr.msk.f32.mxu0 %vm410_vm0, %v4003_v11  ;;  %3104 = vmatprep.subr.bf16.mxu1 %v3103_v7  ;;  %v406_v15 = vld [vmem:[#allocation10 + $0x60] sm:$0xff]  ;;  %v407_v16 = vld [vmem:[#allocation10 + $0x68] sm:$0xff]  ;;  %v3111_v17 = vpack.c.bf16 %v403_v14, %v402_v13  ;;  %v404_v19 = vld [vmem:[#allocation10 + $0x50] sm:$0xff]  ;;  %p3548_p1 = scmp.ne.s32.totalorder %s4178_s4, %s3547_s18  ;;  %s3655_s15 = smov [#allocation15]  }
  0xe2   : > { %3098 = vmatpush3.bf16.msra.mxu0 %v3095_v3  ;;  %3106 = vmatpush3.bf16.msra.mxu1 %v3103_v7  ;;  %v3119_v18 = vpack.c.bf16 %v407_v16, %v406_v15  ;;  %v405_v20 = vld [vmem:[#allocation10 + $0x58] sm:$0xff]  ;;  %v408_v21 = vld [vmem:[#allocation10 + $0x70] sm:$0xff]  ;;  %v726_v26 = vld [vmem:[#allocation12] sm:$0xff]  ;;  %s3551_s19 = sshll.u32 %s3655_s15, 4  ;;  %s3552_s19 = int_to_ptr.vmem [resolvable:$false] %s3551_s19 }
  0xe3   : > { %3100 = vmatprep.subr.bf16.mxu0 %v3099_v8  ;;  %3108 = vmatprep.subr.bf16.mxu1 %v3107_v12  ;;  %v409_v22 = vld [vmem:[#allocation10 + $0x78] sm:$0xff]  ;;  %v3115_v24 = vpack.c.bf16 %v405_v20, %v404_v19  ;;  %v727_v27 = vld [vmem:[#allocation12 + $0x8] sm:$0xff]  ;;  %v730_v28 = vld [vmem:[#allocation12 + $0x20] sm:$0xff]  ;;  %p3549_p8 = pnand %p3548_p1, %p3873_p5  ;;  %s3553_s3 = scalar_lea.vmem %s3552_s19, 512 }
  0xe4   : > { %2906 = vmatprep.mubr.msk.f32.mxu1 %vm410_vm0, %v4003_v11  ;;  %v4011_v23 = vld [vmem:[%s327_s13 + $0x8] sm:$0xff]  ;;  %v3123_v25 = vpack.c.bf16 %v409_v22, %v408_v21  ;;  %v3127_v30 = vpack.c.bf16 %v727_v27, %v726_v26  ;;  %v728_v32 = vld [vmem:[#allocation12 + $0x10] sm:$0xff]  ;;  %v734_v38 = vld [vmem:[#allocation12 + $0x40] sm:$0xff]  ;;  %p3554_p3 = scmp.lt.s32.totalorder %s4178_s4, %s3552_s19  ;;  %p3555_p7 = scmp.lt.s32.totalorder %s3553_s3, %s3547_s18 }
  0xe5   : > { %v731_v29 = vld [vmem:[#allocation12 + $0x28] sm:$0xff]  ;;  %v729_v33 = vld [vmem:[#allocation12 + $0x18] sm:$0xff]  ;;  %v732_v34 = vld [vmem:[#allocation12 + $0x30] sm:$0xff]  ;;  %p3550_p10 = pneg %p3549_p8 }
  0xe6   : > { %3102 = vmatpush3.bf16.msra.mxu0 %v3099_v8  ;;  %3110 = vmatpush3.bf16.msra.mxu1 %v3107_v12  ;;  %v3135_v31 = vpack.c.bf16 %v731_v29, %v730_v28  ;;  %v733_v35 = vld [vmem:[#allocation12 + $0x38] sm:$0xff]  ;;  %v3131_v36 = vpack.c.bf16 %v729_v33, %v728_v32  ;;  %v735_v39 = vld [vmem:[#allocation12 + $0x48] sm:$0xff]  ;;  %v738_v40 = vld [vmem:[#allocation12 + $0x60] sm:$0xff]  ;;  %p3556_p12 = por %p3555_p7, %p3554_p3 }
  0xe7   : > { %3112 = vmatprep.subr.bf16.mxu0 %v3111_v17  ;;  %3120 = vmatprep.subr.bf16.mxu1 %v3119_v18  ;;  %v3139_v37 = vpack.c.bf16 %v733_v35, %v732_v34  ;;  %v739_v41 = vld [vmem:[#allocation12 + $0x68] sm:$0xff]  ;;  %v3143_v42 = vpack.c.bf16 %v735_v39, %v734_v38  ;;  %v736_v44 = vld [vmem:[#allocation12 + $0x50] sm:$0xff]  ;;  %v737_v45 = vld [vmem:[#allocation12 + $0x58] sm:$0xff] }
  0xe8   : > { %v3151_v43 = vpack.c.bf16 %v739_v41, %v738_v40  ;;  %v740_v46 = vld [vmem:[#allocation12 + $0x70] sm:$0xff]  ;;  %v741_v47 = vld [vmem:[#allocation12 + $0x78] sm:$0xff]  ;;  %v3147_v48 = vpack.c.bf16 %v737_v45, %v736_v44  ;;  %v1052_v50 = vld [vmem:[#allocation9] sm:$0xff]  ;;  %p3557_p6 = pnand %p3556_p12, %p3550_p10 }
  0xe9   : > { %2896 = vmatmul.mubr.msk.f32.vlgmr.msra.gmra.mrb[0].mxu0 %vm410_vm0, %v4011_v23  ;;  %2907 = vmatmul.mubr.msk.f32.vlgmr.msra.gmra.mrb[0].mxu1 %vm410_vm0, %v4011_v23  ;;  %v3155_v49 = vpack.c.bf16 %v741_v47, %v740_v46  ;;  %v1053_v51 = vld [vmem:[#allocation9 + $0x8] sm:$0xff]  ;;  %v1056_v52 = vld [vmem:[#allocation9 + $0x20] sm:$0xff]  ;;  %v1054_v56 = vld [vmem:[#allocation9 + $0x10] sm:$0xff] }
  0xea   : > { %3114 = vmatpush3.bf16.msra.mxu0 %v3111_v17  ;;  %3122 = vmatpush3.bf16.msra.mxu1 %v3119_v18  ;;  %v1057_v53 = vld [vmem:[#allocation9 + $0x28] sm:$0xff]  ;;  %v3159_v54 = vpack.c.bf16 %v1053_v51, %v1052_v50  ;;  %v1055_v57 = vld [vmem:[#allocation9 + $0x18] sm:$0xff]  ;;  %v1058_v58 = vld [vmem:[#allocation9 + $0x30] sm:$0xff] }
  0xeb   : > { %3116 = vmatprep.subr.bf16.mxu0 %v3115_v24  ;;  %3124 = vmatprep.subr.bf16.mxu1 %v3123_v25  ;;  %v3167_v55 = vpack.c.bf16 %v1057_v53, %v1056_v52  ;;  %v1059_v59 = vld [vmem:[#allocation9 + $0x38] sm:$0xff]  ;;  %v3163_v60 = vpack.c.bf16 %v1055_v57, %v1054_v56  ;;  %v1060_v62 = vld [vmem:[#allocation9 + $0x40] sm:$0xff]  ;;  %v1061_v63 = vld [vmem:[#allocation9 + $0x48] sm:$0xff] }
  0xec   : > { %2917 = vmatprep.mubr.msk.f32.mxu0 %vm410_vm0, %v4003_v11  ;;  %2928 = vmatprep.mubr.msk.f32.mxu1 %vm410_vm0, %v4003_v11  ;;  %v3171_v61 = vpack.c.bf16 %v1059_v59, %v1058_v58  ;;  %v1050_v0 = vld [vmem:[%s336_s2] sm:$0xff]  ;;  %v1065_v2 = vld [vmem:[#allocation9 + $0x68] sm:$0xff]  ;;  %v3175_v3 = vpack.c.bf16 %v1061_v63, %v1060_v62  ;;  %v1063_v6 = vld [vmem:[#allocation9 + $0x58] sm:$0xff] }
  0xed   : > { %v1064_v1 = vld [vmem:[#allocation9 + $0x60] sm:$0xff]  ;;  %v1062_v5 = vld [vmem:[#allocation9 + $0x50] sm:$0xff]  ;;  %v1067_v8 = vld [vmem:[#allocation9 + $0x78] sm:$0xff] }
  0xee   : > { %3118 = vmatpush3.bf16.msra.mxu0 %v3115_v24  ;;  %3126 = vmatpush3.bf16.msra.mxu1 %v3123_v25  ;;  %v3183_v4 = vpack.c.bf16 %v1065_v2, %v1064_v1  ;;  %v1066_v7 = vld [vmem:[#allocation9 + $0x70] sm:$0xff]  ;;  %v1051_v9 = vld [vmem:[%s336_s2 + $0x8] sm:$0xff]  ;;  %v3179_v10 = vpack.c.bf16 %v1063_v6, %v1062_v5  ;;  %vm4060_vm2 = vmpackc.low %vm717_vm1, %vm717_vm1 }
  0xef   : > { %3128 = vmatprep.subr.bf16.mxu0 %v3127_v30  ;;  %3136 = vmatprep.subr.bf16.mxu1 %v3135_v31 }
  0xf1   : > { %2918 = vmatmul.mubr.msk.f32.vlgmr.msra.gmra.mrb[2].mxu0 %vm410_vm0, %v4011_v23  ;;  %2929 = vmatmul.mubr.msk.f32.vlgmr.msra.gmra.mrb[2].mxu1 %vm410_vm0, %v4011_v23 }
  0xf2   : > { %3130 = vmatpush3.bf16.msra.mxu0 %v3127_v30  ;;  %3138 = vmatpush3.bf16.msra.mxu1 %v3135_v31 }
  0xf3   : > { %3132 = vmatprep.subr.bf16.mxu0 %v3131_v36  ;;  %3140 = vmatprep.subr.bf16.mxu1 %v3139_v37 }
  0xf4   : > { %2939 = vmatprep.mubr.msk.f32.mxu0 %vm410_vm0, %v4003_v11  ;;  %2950 = vmatprep.mubr.msk.f32.mxu1 %vm410_vm0, %v4003_v11 }
  0xf6   : > { %3134 = vmatpush3.bf16.msra.mxu0 %v3131_v36  ;;  %3142 = vmatpush3.bf16.msra.mxu1 %v3139_v37 }
  0xf7   : > { %3144 = vmatprep.subr.bf16.mxu0 %v3143_v42  ;;  %3152 = vmatprep.subr.bf16.mxu1 %v3151_v43 }
  0xf9   : > { %2940 = vmatmul.mubr.msk.f32.vlgmr.msra.gmra.mrb[4].mxu0 %vm410_vm0, %v4011_v23  ;;  %2951 = vmatmul.mubr.msk.f32.vlgmr.msra.gmra.mrb[4].mxu1 %vm410_vm0, %v4011_v23 }
  0xfa   : > { %3146 = vmatpush3.bf16.msra.mxu0 %v3143_v42  ;;  %3154 = vmatpush3.bf16.msra.mxu1 %v3151_v43 }
  0xfb   : > { %3148 = vmatprep.subr.bf16.mxu0 %v3147_v48  ;;  %3156 = vmatprep.subr.bf16.mxu1 %v3155_v49 }
  0xfc   : > { %2961 = vmatprep.mubr.msk.f32.mxu0 %vm410_vm0, %v4003_v11  ;;  %2972 = vmatprep.mubr.msk.f32.mxu1 %vm410_vm0, %v4003_v11  ;;  %v3187_v11 = vpack.c.bf16 %v1067_v8, %v1066_v7 }
  0xfe   : > { %3150 = vmatpush3.bf16.msra.mxu0 %v3147_v48  ;;  %3158 = vmatpush3.bf16.msra.mxu1 %v3155_v49 }
  0xff   : > { %3160 = vmatprep.subr.bf16.mxu0 %v3159_v54  ;;  %3168 = vmatprep.subr.bf16.mxu1 %v3167_v55 }
 0x101   : > { %2962 = vmatmul.mubr.msk.f32.vlgmr.msra.gmra.mrb[6].mxu0 %vm410_vm0, %v4011_v23  ;;  %2973 = vmatmul.mubr.msk.f32.vlgmr.msra.gmra.mrb[6].mxu1 %vm410_vm0, %v4011_v23 }
 0x102   : > { %3162 = vmatpush3.bf16.msra.mxu0 %v3159_v54  ;;  %3170 = vmatpush3.bf16.msra.mxu1 %v3167_v55 }
 0x103   : > { %3164 = vmatprep.subr.bf16.mxu0 %v3163_v60  ;;  %3172 = vmatprep.subr.bf16.mxu1 %v3171_v61 }
 0x104   : > { %2983 = vmatprep.mubr.msk.f32.mxu0 %vm410_vm0, %v1050_v0  ;;  %2994 = vmatprep.mubr.msk.f32.mxu1 %vm410_vm0, %v1050_v0 }
 0x106   : > { %3166 = vmatpush3.bf16.msra.mxu0 %v3163_v60  ;;  %3174 = vmatpush3.bf16.msra.mxu1 %v3171_v61 }
 0x107   : > { %3176 = vmatprep.subr.bf16.mxu0 %v3175_v3  ;;  %3184 = vmatprep.subr.bf16.mxu1 %v3183_v4 }
 0x109   : > { %2984 = vmatmul.mubr.msk.f32.vlgmr.msra.gmra.mrb[8].mxu0 %vm410_vm0, %v1051_v9  ;;  %2995 = vmatmul.mubr.msk.f32.vlgmr.msra.gmra.mrb[8].mxu1 %vm410_vm0, %v1051_v9 }
 0x10a   : > { %3178 = vmatpush3.bf16.msra.mxu0 %v3175_v3  ;;  %3186 = vmatpush3.bf16.msra.mxu1 %v3183_v4 }
 0x10b   : > { %3180 = vmatprep.subr.bf16.mxu0 %v3179_v10  ;;  %3188 = vmatprep.subr.bf16.mxu1 %v3187_v11 }
 0x10c   : > { %3005 = vmatprep.mubr.msk.f32.mxu0 %vm410_vm0, %v1050_v0  ;;  %3016 = vmatprep.mubr.msk.f32.mxu1 %vm410_vm0, %v1050_v0 }
 0x10e   : > { %3182 = vmatpush3.bf16.msra.mxu0 %v3179_v10  ;;  %3190 = vmatpush3.bf16.msra.mxu1 %v3187_v11 }
 0x111   : > { %3006 = vmatmul.mubr.msk.f32.vlgmr.msra.gmra.mrb[10].mxu0 %vm410_vm0, %v1051_v9  ;;  %3017 = vmatmul.mubr.msk.f32.vlgmr.msra.gmra.mrb[10].mxu1 %vm410_vm0, %v1051_v9 }
 0x1bc   : > { %v2897_v12 = vpop.f32.mrb[0].mxu0  ;;  %v2908_v14 = vpop.f32.mrb[0].mxu1 }
 0x1bd   : > { %719 = vst.msk [vmem:[#allocation2 + $0x8] sm:$0xff] %vm717_vm1, %v2897_v12  ;;  %v483_v13 = vpop.f32.mrb[1].mxu0  ;;  %721 = vst.msk [vmem:[#allocation2 + $0x18] sm:$0xff] %vm717_vm1, %v2908_v14  ;;  %v558_v15 = vpop.f32.mrb[1].mxu1 }
 0x1be   : > { %718 = vst.msk [vmem:[#allocation2] sm:$0xff] %vm717_vm1, %v483_v13  ;;  %720 = vst.msk [vmem:[#allocation2 + $0x10] sm:$0xff] %vm717_vm1, %v558_v15 }
 0x1c4   : > { %v2919_v16 = vpop.f32.mrb[2].mxu0  ;;  %v1376_v17 = vld [vmem:[#allocation2 + $0x8] sm:$0xff]  ;;  %v2930_v19 = vpop.f32.mrb[2].mxu1  ;;  %v1378_v22 = vld [vmem:[#allocation2 + $0x18] sm:$0xff] }
 0x1c5   : > { %723 = vst.msk [vmem:[#allocation2 + $0x28] sm:$0xff] %vm717_vm1, %v2919_v16  ;;  %v633_v18 = vpop.f32.mrb[3].mxu0  ;;  %v1375_v20 = vld [vmem:[#allocation2] sm:$0xff]  ;;  %725 = vst.msk [vmem:[#allocation2 + $0x38] sm:$0xff] %vm717_vm1, %v2930_v19  ;;  %v708_v24 = vpop.f32.mrb[3].mxu1  ;;  %v1377_v25 = vld [vmem:[#allocation2 + $0x10] sm:$0xff] }
 0x1c6   : > { %722 = vst.msk [vmem:[#allocation2 + $0x20] sm:$0xff] %vm717_vm1, %v633_v18  ;;  %v3191_v23 = vpack.c.bf16 %v1376_v17, %v1375_v20  ;;  %724 = vst.msk [vmem:[#allocation2 + $0x30] sm:$0xff] %vm717_vm1, %v708_v24  ;;  %v3197_v26 = vpack.c.bf16 %v1378_v22, %v1377_v25 }
 0x1c8   : > { %3193 = vmatprep.subr.msk.bf16.mxu0 %vm4060_vm2, %v3191_v23  ;;  %3199 = vmatprep.subr.msk.bf16.mxu1 %vm4060_vm2, %v3197_v26 }
 0x1c9   : > { %3196 = vmatpush3.bf16.xpose.msk.msra.mxu0 %vm4060_vm2, %v3191_v23  ;;  %3202 = vmatpush3.bf16.xpose.msk.msra.mxu1 %vm4060_vm2, %v3197_v26 }
 0x1cc   : > { %v2941_v27 = vpop.f32.mrb[4].mxu0  ;;  %v1380_v28 = vld [vmem:[#allocation2 + $0x28] sm:$0xff]  ;;  %v2952_v30 = vpop.f32.mrb[4].mxu1  ;;  %v1382_v32 = vld [vmem:[#allocation2 + $0x38] sm:$0xff] }
 0x1cd   : > { %1043 = vst.msk [vmem:[#allocation3 + $0x8] sm:$0xff] %vm717_vm1, %v2941_v27  ;;  %v808_v29 = vpop.f32.mrb[5].mxu0  ;;  %v1379_v31 = vld [vmem:[#allocation2 + $0x20] sm:$0xff]  ;;  %1045 = vst.msk [vmem:[#allocation3 + $0x18] sm:$0xff] %vm717_vm1, %v2952_v30  ;;  %v883_v34 = vpop.f32.mrb[5].mxu1  ;;  %v1381_v35 = vld [vmem:[#allocation2 + $0x30] sm:$0xff] }
 0x1ce   : > { %1042 = vst.msk [vmem:[#allocation3] sm:$0xff] %vm717_vm1, %v808_v29  ;;  %v3203_v33 = vpack.c.bf16 %v1380_v28, %v1379_v31  ;;  %1044 = vst.msk [vmem:[#allocation3 + $0x10] sm:$0xff] %vm717_vm1, %v883_v34  ;;  %v3209_v36 = vpack.c.bf16 %v1382_v32, %v1381_v35 }
 0x1d0   : > { %3205 = vmatprep.subr.msk.bf16.mxu0 %vm4060_vm2, %v3203_v33  ;;  %3211 = vmatprep.subr.msk.bf16.mxu1 %vm4060_vm2, %v3209_v36 }
 0x1d4   : > { %v2963_v37 = vpop.f32.mrb[6].mxu0  ;;  %v2974_v39 = vpop.f32.mrb[6].mxu1  ;;  %v1384_v43 = vld [vmem:[#allocation3 + $0x8] sm:$0xff]  ;;  %v1386_v47 = vld [vmem:[#allocation3 + $0x18] sm:$0xff] }
 0x1d5   : > { %1047 = vst.msk [vmem:[#allocation3 + $0x28] sm:$0xff] %vm717_vm1, %v2963_v37  ;;  %v958_v38 = vpop.f32.mrb[7].mxu0  ;;  %1049 = vst.msk [vmem:[#allocation3 + $0x38] sm:$0xff] %vm717_vm1, %v2974_v39  ;;  %v1033_v40 = vpop.f32.mrb[7].mxu1  ;;  %v1383_v42 = vld [vmem:[#allocation3] sm:$0xff]  ;;  %v1385_v46 = vld [vmem:[#allocation3 + $0x10] sm:$0xff] }
 0x1d6   : > { %1046 = vst.msk [vmem:[#allocation3 + $0x20] sm:$0xff] %vm717_vm1, %v958_v38  ;;  %1048 = vst.msk [vmem:[#allocation3 + $0x30] sm:$0xff] %vm717_vm1, %v1033_v40  ;;  %v3215_v49 = vpack.c.bf16 %v1384_v43, %v1383_v42  ;;  %v3219_v50 = vpack.c.bf16 %v1386_v47, %v1385_v46 }
 0x1dc   : > { %v2985_v41 = vpop.f32.mrb[8].mxu0  ;;  %v2996_v44 = vpop.f32.mrb[8].mxu1  ;;  %v1388_v53 = vld [vmem:[#allocation3 + $0x28] sm:$0xff]  ;;  %v1390_v57 = vld [vmem:[#allocation3 + $0x38] sm:$0xff] }
 0x1dd   : > { %v1141_v45 = vpop.f32.mrb[9].mxu0  ;;  %v1216_v48 = vpop.f32.mrb[9].mxu1  ;;  %v1387_v52 = vld [vmem:[#allocation3 + $0x20] sm:$0xff]  ;;  %v1389_v56 = vld [vmem:[#allocation3 + $0x30] sm:$0xff] }
 0x1de   : > { %3023 = vmatprep.mubr.msk.f32.mxu0 %vm717_vm1, %v1141_v45  ;;  %3030 = vmatprep.mubr.msk.f32.mxu1 %vm717_vm1, %v1216_v48  ;;  %v4098_v59 = vpack.c.bf16 %v1388_v53, %v1387_v52  ;;  %v4101_v60 = vpack.c.bf16 %v1390_v57, %v1389_v56 }
 0x1df   : > { %3024 = vmatmul.mubr.msk.f32.vlgmr.msra.gmra.mrb[12].mxu0 %vm717_vm1, %v2985_v41  ;;  %3031 = vmatmul.mubr.msk.f32.vlgmr.msra.gmra.mrb[12].mxu1 %vm717_vm1, %v2996_v44 }
 0x1e0   : > { %3208 = vmatpush3.bf16.xpose.msk.msra.mxu0 %vm4060_vm2, %v3203_v33  ;;  %3214 = vmatpush3.bf16.xpose.msk.msra.mxu1 %vm4060_vm2, %v3209_v36 }
 0x1e1   : > { %3216 = vmatprep.subr.bf16.mxu0 %v3215_v49  ;;  %3220 = vmatprep.subr.bf16.mxu1 %v3219_v50 }
 0x1e4   : > { %v3007_v51 = vpop.f32.mrb[10].mxu0  ;;  %v3018_v54 = vpop.f32.mrb[10].mxu1 }
 0x1e5   : > { %v1291_v55 = vpop.f32.mrb[11].mxu0  ;;  %v1366_v58 = vpop.f32.mrb[11].mxu1 }
 0x1e6   : > { %3037 = vmatprep.mubr.msk.f32.mxu0 %vm717_vm1, %v1291_v55  ;;  %3044 = vmatprep.mubr.msk.f32.mxu1 %vm717_vm1, %v1366_v58 }
 0x1e7   : > { %3038 = vmatmul.mubr.msk.f32.vlgmr.msra.gmra.mrb[14].mxu0 %vm717_vm1, %v3007_v51  ;;  %3045 = vmatmul.mubr.msk.f32.vlgmr.msra.gmra.mrb[14].mxu1 %vm717_vm1, %v3018_v54 }
 0x1e8   : > { %3218 = vmatpush3.bf16.msra.mxu0 %v3215_v49  ;;  %3222 = vmatpush3.bf16.msra.mxu1 %v3219_v50 }
 0x1e9   : > { %3224 = vmatprep.subr.bf16.mxu0 %v4098_v59  ;;  %3228 = vmatprep.subr.bf16.mxu1 %v4101_v60 }
 0x2b2   : > { %v3025_v61 = vpop.f32.mrb[12].mxu0  ;;  %v3032_v62 = vpop.f32.mrb[12].mxu1 }
 0x2b3   : > { %v1470_v63 = vpop.f32.mrb[13].mxu0  ;;  %v1744_v0 = vsel %vm1740_vm3, %v3025_v61, -inf  ;;  %v1750_v1 = vsel %vm1740_vm3, %v3032_v62, -inf  ;;  %v1557_v2 = vpop.f32.mrb[13].mxu1 }
 0x2b4   : > { %1745 = vmax.xlane.f32.xlu0 %v1744_v0  ;;  %1751 = vmax.xlane.f32.xlu1 %v1750_v1  ;;  %v1741_v3 = vsel %vm1740_vm3, %v1470_v63, -inf  ;;  %v1747_v4 = vsel %vm1740_vm3, %v1557_v2, -inf }
 0x2b8   : > { %1742 = vmax.xlane.f32.xlu0 %v1741_v3  ;;  %1748 = vmax.xlane.f32.xlu1 %v1747_v4 }
 0x2ba   : > { %v3039_v5 = vpop.f32.mrb[14].mxu0  ;;  %v3046_v8 = vpop.f32.mrb[14].mxu1 }
 0x2bb   : > { %v1644_v6 = vpop.f32.mrb[15].mxu0  ;;  %v1756_v7 = vsel %vm1740_vm3, %v3039_v5, -inf  ;;  %v1731_v10 = vpop.f32.mrb[15].mxu1  ;;  %v1762_v11 = vsel %vm1740_vm3, %v3046_v8, -inf }
 0x2bc   : > { %v1753_v9 = vsel %vm1740_vm3, %v1644_v6, -inf  ;;  %1757 = vmax.xlane.f32.xlu1 %v1756_v7  ;;  %v1759_v12 = vsel %vm1740_vm3, %v1731_v10, -inf }
 0x2bd   : > { %1754 = vmax.xlane.f32.xlu0 %v1753_v9 }
 0x2c0   : > { %1763 = vmax.xlane.f32.xlu1 %v1762_v11 }
 0x2c1   : > { %1760 = vmax.xlane.f32.xlu0 %v1759_v12 }
 0x341   : > { %v1746_v13 = vpop.xlane.xlu0 %1745  ;;  %v1752_v14 = vpop.xlane.xlu1 %1751 }
 0x342   : > { %v1766_v15 = vsub.f32 %v3025_v61, %v1746_v13  ;;  %v1768_v16 = vsub.f32 %v3032_v62, %v1752_v14 }
 0x344   : > { %v1775_v17 = vmul.f32 1.442695, %v1766_v15  ;;  %v1779_v18 = vmul.f32 1.442695, %v1768_v16 }
 0x345   : > { %v1743_v19 = vpop.xlane.xlu0 %1742  ;;  %v1749_v20 = vpop.xlane.xlu1 %1748 }
 0x346   : > { %3343 = vpow2.f32 %v1775_v17  ;;  %v1765_v21 = vsub.f32 %v1470_v63, %v1743_v19  ;;  %v1767_v22 = vsub.f32 %v1557_v2, %v1749_v20 }
 0x347   : > { %3345 = vpow2.f32 %v1779_v18 }
 0x348   : > { %v1773_v23 = vmul.f32 1.442695, %v1765_v21  ;;  %v1777_v24 = vmul.f32 1.442695, %v1767_v22 }
 0x349   : > { %v1758_v25 = vpop.xlane.xlu1 %1757 }
 0x34a   : > { %3347 = vpow2.f32 %v1773_v23  ;;  %v1755_v26 = vpop.xlane.xlu0 %1754  ;;  %v1770_v27 = vsub.f32 %v3039_v5, %v1758_v25 }
 0x34b   : > { %v1769_v28 = vsub.f32 %v1644_v6, %v1755_v26  ;;  %3349 = vpow2.f32 %v1777_v24 }
 0x34c   : > { %v1783_v29 = vmul.f32 1.442695, %v1770_v27 }
 0x34d   : > { %v1781_v30 = vmul.f32 1.442695, %v1769_v28  ;;  %v1764_v31 = vpop.xlane.xlu1 %1763 }
 0x34e   : > { %v1761_v32 = vpop.xlane.xlu0 %1760  ;;  %3351 = vpow2.f32 %v1783_v29  ;;  %v1772_v33 = vsub.f32 %v3046_v8, %v1764_v31 }
 0x34f   : > { %v1771_v34 = vsub.f32 %v1731_v10, %v1761_v32  ;;  %3353 = vpow2.f32 %v1781_v30 }
 0x350   : > { %v4113_v35 = vpop.eup %3343  ;;  %v1787_v36 = vmul.f32 1.442695, %v1772_v33 }
 0x351   : > { %v1785_v37 = vmul.f32 1.442695, %v1771_v34  ;;  %v1792_v38 = vsel %vm1740_vm3, %v4113_v35, 0.0  ;;  %v4117_v39 = vpop.eup %3345 }
 0x352   : > { %1793 = vadd.xlane.f32.xlu1 %v1792_v38  ;;  %3355 = vpow2.f32 %v1787_v36  ;;  %v1798_v41 = vsel %vm1740_vm3, %v4117_v39, 0.0  ;;  %v2177_v38 = vld [vmem:[#allocation13] sm:$0xff] }
 0x353   : > { %3357 = vpow2.f32 %v1785_v37 }
 0x354   : > { %v3348_v40 = vpop.eup %3347 }
 0x355   : > { %v1789_v42 = vsel %vm1740_vm3, %v3348_v40, 0.0  ;;  %v3350_v43 = vpop.eup %3349 }
 0x356   : > { %1799 = vadd.xlane.f32.xlu1 %v1798_v41  ;;  %1790 = vadd.xlane.f32.xlu0 %v1789_v42  ;;  %v1795_v45 = vsel %vm1740_vm3, %v3350_v43, 0.0 }
 0x358   : > { %v4122_v44 = vpop.eup %3351 }
 0x359   : > { %v4125_v46 = vpop.eup %3353  ;;  %v1804_v47 = vsel %vm1740_vm3, %v4122_v44, 0.0 }
 0x35a   : > { %1796 = vadd.xlane.f32.xlu0 %v1795_v45  ;;  %1805 = vadd.xlane.f32.xlu1 %v1804_v47  ;;  %v1801_v49 = vsel %vm1740_vm3, %v4125_v46, 0.0 }
 0x35c   : > { %v4129_v48 = vpop.eup %3355 }
 0x35d   : > { %v4133_v50 = vpop.eup %3357  ;;  %v1810_v51 = vsel %vm1740_vm3, %v4129_v48, 0.0 }
 0x35e   : > { %1802 = vadd.xlane.f32.xlu0 %v1801_v49  ;;  %1811 = vadd.xlane.f32.xlu1 %v1810_v51  ;;  %v1807_v52 = vsel %vm1740_vm3, %v4133_v50, 0.0 }
 0x362   : > { %1808 = vadd.xlane.f32.xlu0 %v1807_v52 }
 0x3df   : > { %v1794_v53 = vpop.xlane.xlu1 %1793 }
 0x3e0   : > { %3359 = vrcp.f32 %v1794_v53 }
 0x3e3   : > { %v1800_v54 = vpop.xlane.xlu1 %1799  ;;  %v1791_v55 = vpop.xlane.xlu0 %1790 }
 0x3e4   : > { %3361 = vrcp.f32 %v1800_v54 }
 0x3e5   : > { %3363 = vrcp.f32 %v1791_v55 }
 0x3e7   : > { %v1797_v56 = vpop.xlane.xlu0 %1796  ;;  %v1806_v57 = vpop.xlane.xlu1 %1805 }
 0x3e8   : > { %3365 = vrcp.f32 %v1797_v56 }
 0x3e9   : > { %3367 = vrcp.f32 %v1806_v57 }
 0x3ea   : > { %v3360_v58 = vpop.eup %3359 }
 0x3eb   : > { %v1822_v61 = vmul.f32 %v3360_v58, %v1794_v53  ;;  %v1803_v62 = vpop.xlane.xlu0 %1802  ;;  %v1812_v63 = vpop.xlane.xlu1 %1811 }
 0x3ec   : > { %3369 = vrcp.f32 %v1803_v62 }
 0x3ed   : > { %3371 = vrcp.f32 %v1812_v63  ;;  %v1830_v2 = vsub.f32 2.0, %v1822_v61 }
 0x3ee   : > { %v3362_v0 = vpop.eup %3361 }
 0x3ef   : > { %v3364_v1 = vpop.eup %3363  ;;  %v1824_v3 = vmul.f32 %v3362_v0, %v1800_v54  ;;  %v1809_v4 = vpop.xlane.xlu0 %1808  ;;  %v1838_v10 = vmul.f32 %v3360_v58, %v1830_v2 }
 0x3f0   : > { %v1821_v5 = vmul.f32 %v3364_v1, %v1791_v55  ;;  %3373 = vrcp.f32 %v1809_v4 }
 0x3f1   : > { %v1832_v7 = vsub.f32 2.0, %v1824_v3  ;;  %v1846_v20 = vmul.f32 %v4113_v35, %v1838_v10 }
 0x3f2   : > { %v3366_v6 = vpop.eup %3365  ;;  %v1829_v8 = vsub.f32 2.0, %v1821_v5 }
 0x3f3   : > { %v3368_v9 = vpop.eup %3367  ;;  %v1823_v11 = vmul.f32 %v3366_v6, %v1797_v56  ;;  %v1840_v16 = vmul.f32 %v3362_v0, %v1832_v7 }
 0x3f4   : > { %v1837_v12 = vmul.f32 %v3364_v1, %v1829_v8  ;;  %v1826_v13 = vmul.f32 %v3368_v9, %v1806_v57 }
 0x3f5   : > { %v1831_v14 = vsub.f32 2.0, %v1823_v11  ;;  %v1848_v27 = vmul.f32 %v4117_v39, %v1840_v16  ;;  %v2179_v39 = vld [vmem:[#allocation13 + $0x10] sm:$0xff] }
 0x3f6   : > { %v3370_v15 = vpop.eup %3369  ;;  %v1845_v17 = vmul.f32 %v3348_v40, %v1837_v12  ;;  %v1834_v18 = vsub.f32 2.0, %v1826_v13  ;;  %v2180_v40 = vld [vmem:[#allocation13 + $0x18] sm:$0xff] }
 0x3f7   : > { %v3372_v19 = vpop.eup %3371  ;;  %v1839_v21 = vmul.f32 %v3366_v6, %v1831_v14  ;;  %v1825_v22 = vmul.f32 %v3370_v15, %v1803_v62 }
 0x3f8   : > { %v1828_v23 = vmul.f32 %v3372_v19, %v1812_v63  ;;  %3051 = vmatprep.mubr.msk.f32.mxu0 %vm1740_vm3, %v1845_v17  ;;  %v1842_v28 = vmul.f32 %v3368_v9, %v1834_v18 }
 0x3f9   : > { %v1847_v24 = vmul.f32 %v3350_v43, %v1839_v21  ;;  %v1833_v25 = vsub.f32 2.0, %v1825_v22  ;;  %3052 = vmatmul.mubr.msk.f32.vlgmr.msra.gmra.mrb[16].mxu0 %vm1740_vm3, %v1846_v20 }
 0x3fa   : > { %v3374_v26 = vpop.eup %3373  ;;  %v1836_v29 = vsub.f32 2.0, %v1828_v23  ;;  %3226 = vmatpush3.bf16.msra.mxu0 %v4098_v59  ;;  %v1850_v34 = vmul.f32 %v4122_v44, %v1842_v28 }
 0x3fb   : > { %v1841_v30 = vmul.f32 %v3370_v15, %v1833_v25  ;;  %v1827_v31 = vmul.f32 %v3374_v26, %v1809_v4  ;;  %3058 = vmatprep.mubr.msk.f32.mxu1 %vm1740_vm3, %v1847_v24  ;;  %3075 = vmatprep.subr.mxu0 %v2177_v38 }
 0x3fc   : > { %3059 = vmatmul.mubr.msk.f32.vlgmr.msra.gmra.mrb[16].mxu1 %vm1740_vm3, %v1848_v27  ;;  %v1844_v35 = vmul.f32 %v3372_v19, %v1836_v29 }
 0x3fd   : > { %v1849_v32 = vmul.f32 %v4125_v46, %v1841_v30  ;;  %v1835_v33 = vsub.f32 2.0, %v1827_v31  ;;  %3230 = vmatpush3.bf16.msra.mxu1 %v4101_v60  ;;  %v2178_v60 = vld [vmem:[#allocation13 + $0x8] sm:$0xff] }
 0x3fe   : > { %v1852_v37 = vmul.f32 %v4129_v48, %v1844_v35  ;;  %3080 = vmatprep.subr.mxu1 %v2178_v60 }
 0x3ff   : > { %v1843_v36 = vmul.f32 %v3374_v26, %v1835_v33  ;;  %3065 = vmatprep.mubr.msk.f32.mxu0 %vm1740_vm3, %v1849_v32 }
 0x400   : > { %3066 = vmatmul.mubr.msk.f32.vlgmr.msra.gmra.mrb[18].mxu0 %vm1740_vm3, %v1850_v34 }
 0x401   : > { %v1851_v59 = vmul.f32 %v4133_v50, %v1843_v36  ;;  %3076 = vmatpush3.msra.mxu0 %v2177_v38 }
 0x402   : > { %3085 = vmatprep.subr.mxu0 %v2179_v39 }
 0x403   : > { %3072 = vmatprep.mubr.msk.f32.mxu1 %vm1740_vm3, %v1851_v59 }
 0x404   : > { %3073 = vmatmul.mubr.msk.f32.vlgmr.msra.gmra.mrb[18].mxu1 %vm1740_vm3, %v1852_v37 }
 0x405   : > { %3081 = vmatpush3.msra.mxu1 %v2178_v60 }
 0x406   : > { %3090 = vmatprep.subr.mxu1 %v2180_v40 }
 0x4cc   : > { %v3053_v41 = vpop.f32.mrb[16].mxu0 }
 0x4cd   : > { %v1925_v42 = vpop.f32.mrb[17].mxu0 }
 0x4ce   : > { %3077 = vmatprep.mubr.msk.f32.mxu0 %vm717_vm1, %v1925_v42 }
 0x4cf   : > { %3078 = vmatmul.mubr.msk.f32.vlgmr.msra.gmra.mrb[20].mxu0 %vm717_vm1, %v3053_v41  ;;  %v3060_v43 = vpop.f32.mrb[16].mxu1 }
 0x4d0   : > { %v2006_v44 = vpop.f32.mrb[17].mxu1  ;;  %3086 = vmatpush3.msra.mxu0 %v2179_v39 }
 0x4d1   : > { %3082 = vmatprep.mubr.msk.f32.mxu1 %vm717_vm1, %v2006_v44 }
 0x4d2   : > { %3083 = vmatmul.mubr.msk.f32.vlgmr.msra.gmra.mrb[20].mxu1 %vm717_vm1, %v3060_v43 }
 0x4d3   : > { %v3067_v45 = vpop.f32.mrb[18].mxu0  ;;  %3091 = vmatpush3.msra.mxu1 %v2180_v40 }
 0x4d4   : > { %v2087_v46 = vpop.f32.mrb[19].mxu0 }
 0x4d5   : > { %3087 = vmatprep.mubr.msk.f32.mxu0 %vm717_vm1, %v2087_v46 }
 0x4d6   : > { %3088 = vmatmul.mubr.msk.f32.vlgmr.msra.gmra.mrb[22].mxu0 %vm717_vm1, %v3067_v45 }
 0x4d7   : > { %v3074_v47 = vpop.f32.mrb[18].mxu1 }
 0x4d8   : > { %v2168_v48 = vpop.f32.mrb[19].mxu1 }
 0x4d9   : > { %3092 = vmatprep.mubr.msk.f32.mxu1 %vm717_vm1, %v2168_v48 }
 0x4da   : > { %3093 = vmatmul.mubr.msk.f32.vlgmr.msra.gmra.mrb[22].mxu1 %vm717_vm1, %v3074_v47 }
 0x5a2   : > { %v3079_v49 = vpop.f32.mrb[20].mxu0 }
 0x5a3   : > { %v2253_v50 = vpop.f32.mrb[21].mxu0  ;;  %v2512_v52 = vsel %vm410_vm0, %v3079_v49, 0.0 }
 0x5a4   : > { %v2505_v55 = vsel %vm410_vm0, %v2253_v50, 0.0 }
 0x5a5   : > { %v3084_v51 = vpop.f32.mrb[20].mxu1 }
 0x5a6   : > { %v2513_v53 = vsel %vm410_vm0, %v3084_v51, 0.0  ;;  %v2334_v54 = vpop.f32.mrb[21].mxu1 }
 0x5a7   : > { %v2514_v56 = vadd.f32 %v2513_v53, %v2512_v52  ;;  %v2506_v57 = vsel %vm410_vm0, %v2334_v54, 0.0 }
 0x5a8   : > { %v2507_v58 = vadd.f32 %v2506_v57, %v2505_v55 }
 0x5a9   : > { %v3089_v61 = vpop.f32.mrb[22].mxu0 }
 0x5aa   : > { %v2515_v62 = vsel %vm410_vm0, %v3089_v61, 0.0  ;;  %v2415_v63 = vpop.f32.mrb[23].mxu0 }
 0x5ab   : > { %v2516_v0 = vadd.f32 %v2515_v62, %v2514_v56  ;;  %v2508_v1 = vsel %vm410_vm0, %v2415_v63, 0.0 }
 0x5ac   : > { %v2509_v2 = vadd.f32 %v2508_v1, %v2507_v58 }
 0x5ad   : > { %v3094_v3 = vpop.f32.mrb[22].mxu1 }
 0x5ae   : > { %v2517_v4 = vsel %vm410_vm0, %v3094_v3, 0.0  ;;  %v2496_v5 = vpop.f32.mrb[23].mxu1 }
 0x5af   : > { %v2518_v6 = vadd.f32 %v2517_v4, %v2516_v0  ;;  %v2510_v7 = vsel %vm410_vm0, %v2496_v5, 0.0 }
 0x5b0   : > { %v2511_v8 = vadd.f32 %v2510_v7, %v2509_v2 }
 0x5b1   : > { %2520 = vst.msk [vmem:[%s385_s29 + $0x8] sm:$0xff] %vm410_vm0, %v2518_v6 }
 0x5b2   : > { %2519 = vst.msk [vmem:[%s385_s29] sm:$0xff] %vm410_vm0, %v2511_v8 }
 0x5b3   : > { %3560 = shalt.err (!%p3557_p6)
}
 0x5b4   : > { %s3561_s16 = scalar_lea.hbm %s4176_s14, 256  ;;  %s3565_s0 = scalar_lea.hbm %s4235_s6, 512 }
 0x5b5   : > { %p3562_p11 = scmp.ne.s32.totalorder %s4176_s14, %s3561_s16  ;;  %p3566_p2 = scmp.lt.u32.totalorder %s4176_s14, %s4235_s6 }
 0x5b6   : > { %p3567_p13 = scmp.lt.u32.totalorder %s3565_s0, %s3561_s16  ;;  %p3569_p1 = scmp.lt.u32.totalorder %s3561_s16, %s4176_s14 }
 0x5b7   : > { %p3563_p9 = pnand %p3562_p11, %p3873_p5 }
 0x5b8   : > { %p3568_p4 = por %p3567_p13, %p3566_p2 }
 0x5b9   : > { %p3564_p0 = pneg %p3563_p9 }
 0x5ba   : > { %p3570_p8 = por %p3569_p1, %p3568_p4 }
 0x5bc   : > { %p3571_p10 = pnand %p3570_p8, %p3564_p0 }
 0x5be   : > { %3574 = shalt.err (!%p3571_p10)
}
 0x5bf   : > { %s3656_s13 = smov 128   ;;  %s3657_s7 = smov 8  }
 0x5c0   : > { %3251 = dma.vmem_to_hbm [thread:$0]  (%p3873_p5), %s4178_s4, 256, %s4176_s14, %s2522_s24, %s3656_s13, %s3656_s13, %s3657_s7  }
 0x5c1 PF: > { %s4277_s8 = sld [smem:[#allocation22_spill]]  ;;  %s4278_s2 = sld [smem:[#allocation23_spill]] }
 0x5c2   : > { %p4280_p7 = scmp.ge.s32.totalorder %s3645_s26, 2 }
 0x5c7   : > { %s2552_s27 = sand.u32 1, %s4277_s8   ;;  %p4279_p3 = scmp.ne.s32.totalorder %s4278_s2, 0 }
 0x5c8   : > { %s2553_s29 = scalar_lea.sflag [#allocation6], %s2552_s27 }
 0x5c9   : > { %p3274_p12 = pnand %p4280_p7, %p4279_p3 }
 0x5cb   : > { %3620 = dma.done.wait (!%p3274_p12), %s2553_s29, 256  }
 0x5cc   : > { %3622 = vsyncadd (!%p3274_p12), %s2553_s29, 4294967040  ;;  %s27_s26 = sadd.s32 1, %s3645_s26   ;;  %s4281_s21 = smov %s3629_s22 }
 0x5cd   : > { %p24_p6 = scmp.ge.s32.totalorder %s27_s26, 4   ;;  %s4282_s22 = smov %s3633_s23 }
 0x5ce   : > { %s4283_s23 = smov %s3884_s28  ;;  %s4284_s24 = smov %s3641_s25 }
 0x5cf   : > { %s4285_s25 = smov %s4287_s20  ;;  %26 = sbr.rel (!%p24_p6) target bundleno = 16 (0x10), region = 122 }
 0x5d6   :  { %2558 = vsyncpa [#allocation5], 1 }
 0x5d7   :  { %2560 = vsyncpa [#allocation5 + $0x1], 1 }
 0x5d8   :  { %2561 = vsyncpa [#allocation8], 1 }
 0x5d9   :  { %2563 = vsyncpa [#allocation8 + $0x1], 1 }
 0x5da   :  { %2564 = vsyncpa [#allocation11], 1 }
 0x5db   :  { %2565 = vsyncpa [#allocation14], 1 }
 0x5dc   :  { %2566 = vsyncpa [#allocation6], 1 }
 0x5dd   :  { %2568 = vsyncpa [#allocation6 + $0x1], 1 }

</bundles_post_ra>
